<compile_context>
chip_gen: v6e
topology: v6e:2x2x1
jax: 0.10.0
libtpu: 0.0.40
codegen_flags: <defaults>
</compile_context>

<pallas_src>
import jax
import jax.numpy as jnp
from jax import lax
from jax.experimental import pallas as pl
from jax.experimental.pallas import tpu as pltpu


def _encoder_kernel(x_ref, w_ref, b_ref, o_ref):
    """One (b, n, k) tile of y = x @ W^T + bias.

    x_ref : (tb, tk)  flattened-input tile
    w_ref : (tn, tk)  weight tile in native (out_features, in_features) layout
    b_ref : (1,  tn)  bias tile (same block for every k)
    o_ref : (tb, tn)  f32 output tile, resident across the K axis
    """
    k = pl.program_id(2)

    # MXU matmul contracting the last axis of both operands (x @ W^T),
    # accumulating in f32.
    acc = lax.dot_general(
        x_ref[...],
        w_ref[...],
        dimension_numbers=(((1,), (1,)), ((), ())),
        preferred_element_type=jnp.float32,
    )

    @pl.when(k == 0)
    def _():
        # Fuse the bias into the first K step: single store, no zero-init RMW.
        o_ref[...] = acc + b_ref[...].astype(jnp.float32)

    @pl.when(k > 0)
    def _():
        o_ref[...] += acc


def _round_up(v, m):
    return ((v + m - 1) // m) * m


def _pick_tile(dim, cap):
    """Return (tile, padded_dim).

    If the dim fits under `cap`, use a single full-extent block (always legal,
    no padding).  Otherwise tile at `cap` (a multiple of 8/128 by construction)
    and pad the dim up to a multiple of it.
    """
    if dim <= cap:
        return dim, dim
    return cap, _round_up(dim, cap)


def image_encoder_forward(x, weight, bias, *, block_b=256, block_n=256,
                          block_k=2048, compute_dtype=None):
    """Pallas equivalent of ImageEncoder.forward.

    x      : (B, C, H, W) float32
    weight : (output_dim, C*H*W)   — native PyTorch nn.Linear layout (NOT transposed)
    bias   : (output_dim,)
    returns: (B, output_dim) float32
    """
    assert block_b % 8 == 0 and block_n % 128 == 0 and block_k % 128 == 0
    B = x.shape[0]
    K = int(x.shape[1] * x.shape[2] * x.shape[3])
    N = weight.shape[0]
    assert weight.shape[1] == K

    # Glue: row-major flatten, identical to nn.Flatten on NCHW.
    x_flat = x.reshape(B, K)

    # Optional bf16 operands (v6e/v7x MXU); accumulation stays f32 in-kernel.
    if compute_dtype is not None:
        x_flat = x_flat.astype(compute_dtype)
        weight = weight.astype(compute_dtype)

    tb, Bp = _pick_tile(B, block_b)
    tn, Np = _pick_tile(N, block_n)
    tk, Kp = _pick_tile(K, block_k)

    # Only pad dims that are actually tiled (no pad at all at small shapes).
    if (Bp, Kp) != (B, K):
        x_flat = jnp.pad(x_flat, ((0, Bp - B), (0, Kp - K)))
    w = weight
    if (Np, Kp) != (N, K):
        w = jnp.pad(w, ((0, Np - N), (0, Kp - K)))
    b2d = bias.astype(jnp.float32).reshape(1, N)
    if Np != N:
        b2d = jnp.pad(b2d, ((0, 0), (0, Np - N)))

    grid = (Bp // tb, Np // tn, Kp // tk)

    # Max per-step VMEM at the default tile caps (f32, double-buffered inputs +
    # resident output) is < 10 MiB — within the default scoped VMEM limit on
    # v5e (16 MiB), v6e (32 MiB) and v7x (32 MiB); no vmem_limit_bytes needed.
    out = pl.pallas_call(
        _encoder_kernel,
        out_shape=jax.ShapeDtypeStruct((Bp, Np), jnp.float32),
        grid_spec=pltpu.PrefetchScalarGridSpec(
            num_scalar_prefetch=0,
            grid=grid,
            in_specs=[
                pl.BlockSpec((tb, tk), lambda b, n, k: (b, k)),
                pl.BlockSpec((tn, tk), lambda b, n, k: (n, k)),
                pl.BlockSpec((1, tn), lambda b, n, k: (0, n)),
            ],
            out_specs=pl.BlockSpec((tb, tn), lambda b, n, k: (b, n)),
        ),
        compiler_params=pltpu.CompilerParams(
            dimension_semantics=("parallel", "parallel", "arbitrary"),
        ),
    )(x_flat, w, b2d)

    if (Bp, Np) != (B, N):
        out = out[:B, :N]
    return out


def init_image_encoder_params(key, input_channels, input_size, output_dim):
    """Deterministic init matching nn.Linear's shapes (uniform ±1/sqrt(fan_in))."""
    C, (H, W) = input_channels, input_size
    in_features = C * H * W
    k_w, k_b = jax.random.split(key)
    bound = 1.0 / jnp.sqrt(in_features)
    weight = jax.random.uniform(
        k_w, (output_dim, in_features), jnp.float32, -bound, bound
    )
    bias = jax.random.uniform(
        k_b, (output_dim,), jnp.float32, -bound, bound
    )
    return weight, bias


if __name__ == "__main__":
    key = jax.random.PRNGKey(0)
    k_x, k_p = jax.random.split(key)

    # Small shapes consistent with the module: (B*T, C, H, W)
    B, C, H, W = 2, 4, 16, 16          # in_features = 1024
    output_dim = 128

    x = jax.random.normal(k_x, (B, C, H, W), jnp.float32)
    weight, bias = init_image_encoder_params(k_p, C, (H, W), output_dim)

    out = image_encoder_forward(x, weight, bias)
    out = jax.block_until_ready(out)

    # Pure-JAX reference check (flatten + linear).
    ref = x.reshape(B, -1) @ weight.T + bias
    assert out.shape == (B, output_dim)
    assert jnp.allclose(out, ref, atol=1e-4, rtol=1e-4), "mismatch vs reference"

    print("KERNEL_OK")
</pallas_src>

<mosaic_0001>
module attributes {stable_mosaic.version = 11 : i64} {
  func.func @_encoder_kernel(%arg0: i32, %arg1: i32, %arg2: i32, %arg3: memref<2x1024xf32, #tpu.memory_space<vmem>>, %arg4: memref<128x1024xf32, #tpu.memory_space<vmem>>, %arg5: memref<1x128xf32, #tpu.memory_space<vmem>>, %arg6: memref<2x128xf32, #tpu.memory_space<vmem>>) attributes {dimension_semantics = [#tpu.dimension_semantics<parallel>, #tpu.dimension_semantics<parallel>, #tpu.dimension_semantics<arbitrary>], iteration_bounds = array<i64: 1, 1, 1>, scalar_prefetch = 0 : i64, scratch_operands = 0 : i64, tpu.core_type = #tpu.core_type<tc>, window_params = [{transform_indices = @transform_0, window_bounds = array<i64: 2, 1024>}, {transform_indices = @transform_1, window_bounds = array<i64: 128, 1024>}, {transform_indices = @transform_2, window_bounds = array<i64: 1, 128>}, {transform_indices = @transform_3, window_bounds = array<i64: 2, 128>}]} {
    %c0 = arith.constant 0 : index
    %c0_0 = arith.constant 0 : index
    %0 = vector.load %arg3[%c0, %c0_0] : memref<2x1024xf32, #tpu.memory_space<vmem>>, vector<2x1024xf32>
    %c0_1 = arith.constant 0 : index
    %c0_2 = arith.constant 0 : index
    %1 = vector.load %arg4[%c0_1, %c0_2] : memref<128x1024xf32, #tpu.memory_space<vmem>>, vector<128x1024xf32>
    %cst = arith.constant dense<0.000000e+00> : vector<2x128xf32>
    %2 = tpu.matmul %0, %1, %cst {dimension_numbers = #tpu.dot_dimension_numbers<[1], [1], [0], [0], [0, 0, 1, 0], [], []>} : vector<2x1024xf32>, vector<128x1024xf32>, vector<2x128xf32> -> vector<2x128xf32>
    %c0_i32 = arith.constant 0 : i32
    %3 = arith.cmpi eq, %arg2, %c0_i32 : i32
    %4 = arith.extui %3 : i1 to i32
    %c0_i32_3 = arith.constant 0 : i32
    %5 = arith.cmpi ne, %4, %c0_i32_3 : i32
    scf.if %5 {
      %c0_6 = arith.constant 0 : index
      %c0_7 = arith.constant 0 : index
      %9 = vector.load %arg5[%c0_6, %c0_7] : memref<1x128xf32, #tpu.memory_space<vmem>>, vector<1x128xf32>
      %10 = vector.broadcast %9 : vector<1x128xf32> to vector<2x128xf32>
      %11 = arith.addf %2, %10 : vector<2x128xf32>
      %c0_8 = arith.constant 0 : index
      %c0_9 = arith.constant 0 : index
      %12 = vector.load %arg6[%c0_8, %c0_9] : memref<2x128xf32, #tpu.memory_space<vmem>>, vector<2x128xf32>
      tpu.vector_store %arg6[%c0_8, %c0_9], %11 {strides = array<i32>} : memref<2x128xf32, #tpu.memory_space<vmem>>, vector<2x128xf32>,
    } else {
    }
    %c0_i32_4 = arith.constant 0 : i32
    %6 = arith.cmpi sgt, %arg2, %c0_i32_4 : i32
    %7 = arith.extui %6 : i1 to i32
    %c0_i32_5 = arith.constant 0 : i32
    %8 = arith.cmpi ne, %7, %c0_i32_5 : i32
    scf.if %8 {
      %c0_6 = arith.constant 0 : index
      %c0_7 = arith.constant 0 : index
      %9 = vector.load %arg6[%c0_6, %c0_7] : memref<2x128xf32, #tpu.memory_space<vmem>>, vector<2x128xf32>
      %10 = arith.addf %9, %2 : vector<2x128xf32>
      %c0_8 = arith.constant 0 : index
      %c0_9 = arith.constant 0 : index
      %11 = vector.load %arg6[%c0_8, %c0_9] : memref<2x128xf32, #tpu.memory_space<vmem>>, vector<2x128xf32>
      tpu.vector_store %arg6[%c0_8, %c0_9], %10 {strides = array<i32>} : memref<2x128xf32, #tpu.memory_space<vmem>>, vector<2x128xf32>,
    } else {
    }
    return
  }
  func.func @transform_0(%arg0: i32, %arg1: i32, %arg2: i32) -> (i32, i32) {
    %c0_i32 = arith.constant 0 : i32
    return %arg0, %arg2 : i32, i32
  }
  func.func @transform_1(%arg0: i32, %arg1: i32, %arg2: i32) -> (i32, i32) {
    %c0_i32 = arith.constant 0 : i32
    return %arg1, %arg2 : i32, i32
  }
  func.func @transform_2(%arg0: i32, %arg1: i32, %arg2: i32) -> (i32, i32) {
    %c0_i32 = arith.constant 0 : i32
    %c0_i32_0 = arith.constant 0 : i32
    return %c0_i32, %arg1 : i32, i32
  }
  func.func @transform_3(%arg0: i32, %arg1: i32, %arg2: i32) -> (i32, i32) {
    %c0_i32 = arith.constant 0 : i32
    return %arg0, %arg1 : i32, i32
  }
}

</mosaic_0001>

<bundles_post_ra>
// kernel: tpu_custom_call.1
= control target key start
LH: loop header
LB: loop body
LE: loop exit
PB: predicated region body
PF: predicated region fallthrough
CT: control target
= control target key end

     0   :  { %8 = vsyncpa [#allocation3], 0  ;;  %s670_s0 = inlined_call_operand.hbm [shape: f32[2,1024], index: 0, kind: input, shape index: {}]   ;;  %s671_s1 = inlined_call_operand.hbm [shape: f32[128,1024], index: 1, kind: input, shape index: {}]   ;;  %s672_s2 = inlined_call_operand.vmem [shape: f32[1,128], index: 2, kind: input, shape index: {}]   ;;  %s673_s3 = inlined_call_operand.hbm [shape: f32[2,128], index: 3, kind: output, shape index: {}]  }
   0x1   :  { %9 = vsyncpa [#allocation6], 0 }
   0x2   :  { %10 = vsyncpa [#allocation4], 0  ;;  %s606_s12 = smov [#allocation2]   ;;  %s607_s14 = smov [#allocation5]  }
   0x3   :  { %s17_s13 = sshll.u32 %s606_s12, 4  ;;  %s26_s15 = sshll.u32 %s607_s14, 4  ;;  %s18_s13 = int_to_ptr.vmem [resolvable:$true] %s17_s13  ;;  %s27_s15 = int_to_ptr.vmem [resolvable:$true] %s26_s15 }
   0x4   :  { %s548_s16 = scalar_lea.vmem %s18_s13, 256  ;;  %p553_p1 = scmp.lt.s32.totalorder %s18_s13, %s18_s13 }
   0x5   :  { %p549_p0 = scmp.ne.s32.totalorder %s18_s13, %s548_s16  ;;  %p554_p2 = scmp.lt.s32.totalorder %s548_s16, %s548_s16 }
   0x7   :  { %p555_p3 = por %p554_p2, %p553_p1 }
   0x9   :  { %p556_p4 = pnand %p555_p3, %p549_p0 }
   0xb   :  { %559 = shalt.err (!%p556_p4)
}
   0xc   :  { %20 = dma.hbm_to_vmem [thread:$0]  %s670_s0, 256, %s18_s13, [#allocation3]  }
   0xd   :  { %s568_s19 = scalar_lea.vmem %s27_s15, 16384  ;;  %p573_p6 = scmp.lt.s32.totalorder %s27_s15, %s27_s15 }
   0xe   :  { %p569_p5 = scmp.ne.s32.totalorder %s27_s15, %s568_s19  ;;  %p574_p7 = scmp.lt.s32.totalorder %s568_s19, %s568_s19 }
  0x10   :  { %p575_p8 = por %p574_p7, %p573_p6 }
  0x12   :  { %p576_p9 = pnand %p575_p8, %p569_p5 }
  0x14   :  { %579 = shalt.err (!%p576_p9)
}
  0x15   :  { %s608_s20 = smov 1024   ;;  %s609_s21 = smov 64  }
  0x16   :  { %32 = dma.hbm_to_vmem [thread:$0]  %s671_s1, 16384, %s27_s15, [#allocation6], %s608_s20, %s608_s20, %s609_s21  }
  0x17   :  { %600 = dma.done.wait [#allocation3], 256  }
  0x18   :  { %601 = vsyncadd [#allocation3], 4294967040 }
  0x19   :  { %602 = dma.done.wait [#allocation6], 16384  }
  0x1a   :  { %603 = vsyncadd [#allocation6], 4294950912  ;;  %v164_v0 = vld [vmem:[#allocation5 + $0x3c8] sm:$0xff]  ;;  %v166_v1 = vld [vmem:[#allocation5 + $0x3d8] sm:$0xff]  ;;  %v610_v14 = vmov 1983009808   ;;  %v177_v16 = vlaneseq }
  0x1b   :  { %v163_v2 = vld [vmem:[#allocation5 + $0x3c0] sm:$0xff]  ;;  %215 = vmatprep.subr.mxu0 %v164_v0  ;;  %285 = vmatprep.subr.mxu1 %v166_v1  ;;  %v165_v3 = vld [vmem:[#allocation5 + $0x3d0] sm:$0xff]  ;;  %v156_v4 = vld [vmem:[#allocation5 + $0x388] sm:$0xff]  ;;  %v175_v15 = vunpack.c.l.s4 %v610_v14  ;;  %s611_s24 = smov [#allocation7]  }
  0x1c   :  { %v158_v5 = vld [vmem:[#allocation5 + $0x398] sm:$0xff]  ;;  %216 = vmatpush1.xpose.msra.mxu0 %v163_v2  ;;  %286 = vmatpush1.xpose.msra.mxu1 %v165_v3  ;;  %v155_v6 = vld [vmem:[#allocation5 + $0x380] sm:$0xff]  ;;  %v157_v7 = vld [vmem:[#allocation5 + $0x390] sm:$0xff]  ;;  %v178_v22 = vshrl.u32 %v177_v16, 7  ;;  %s521_s25 = sshll.u32 %s611_s24, 4  ;;  %s522_s25 = int_to_ptr.vmem [resolvable:$true] %s521_s25 }
  0x1d   :  { %217 = vmatprep.subr.mxu0 %v156_v4  ;;  %287 = vmatprep.subr.mxu1 %v158_v5  ;;  %v148_v8 = vld [vmem:[#allocation5 + $0x348] sm:$0xff]  ;;  %v150_v9 = vld [vmem:[#allocation5 + $0x358] sm:$0xff]  ;;  %v147_v10 = vld [vmem:[#allocation5 + $0x340] sm:$0xff]  ;;  %v176_v21 = vunpack.c.0.s8 %v175_v15  ;;  %s580_s26 = scalar_lea.vmem %s522_s25, 32  ;;  %p585_p11 = scmp.lt.s32.totalorder %s522_s25, %s522_s25 }
  0x1e   :  { %v149_v11 = vld [vmem:[#allocation5 + $0x350] sm:$0xff]  ;;  %v140_v12 = vld [vmem:[#allocation5 + $0x308] sm:$0xff]  ;;  %v142_v13 = vld [vmem:[#allocation5 + $0x318] sm:$0xff]  ;;  %p581_p10 = scmp.ne.s32.totalorder %s522_s25, %s580_s26  ;;  %p586_p12 = scmp.lt.s32.totalorder %s580_s26, %s580_s26 }
  0x1f   :  { %v139_v17 = vld [vmem:[#allocation5 + $0x300] sm:$0xff]  ;;  %v141_v18 = vld [vmem:[#allocation5 + $0x310] sm:$0xff]  ;;  %v132_v19 = vld [vmem:[#allocation5 + $0x2c8] sm:$0xff]  ;;  %v638_v27 = vsub.s32 %v176_v21, %v178_v22 }
  0x20   :  { %218 = vmatpush1.xpose.msra.mxu0 %v155_v6  ;;  %288 = vmatpush1.xpose.msra.mxu1 %v157_v7  ;;  %v134_v20 = vld [vmem:[#allocation5 + $0x2d8] sm:$0xff]  ;;  %v131_v23 = vld [vmem:[#allocation5 + $0x2c0] sm:$0xff]  ;;  %v133_v24 = vld [vmem:[#allocation5 + $0x2d0] sm:$0xff]  ;;  %p587_p13 = por %p586_p12, %p585_p11 }
  0x21   :  { %219 = vmatprep.subr.mxu0 %v148_v8  ;;  %289 = vmatprep.subr.mxu1 %v150_v9  ;;  %v124_v25 = vld [vmem:[#allocation5 + $0x288] sm:$0xff]  ;;  %v126_v26 = vld [vmem:[#allocation5 + $0x298] sm:$0xff]  ;;  %v123_v28 = vld [vmem:[#allocation5 + $0x280] sm:$0xff] }
  0x22   :  { %v125_v29 = vld [vmem:[#allocation5 + $0x290] sm:$0xff]  ;;  %v116_v30 = vld [vmem:[#allocation5 + $0x248] sm:$0xff]  ;;  %v118_v31 = vld [vmem:[#allocation5 + $0x258] sm:$0xff]  ;;  %p588_p0 = pnand %p587_p13, %p581_p10 }
  0x23   :  { %v41_v32 = vld [vmem:[#allocation2] sm:$0xff]  ;;  %v115_v35 = vld [vmem:[#allocation5 + $0x240] sm:$0xff]  ;;  %v108_v37 = vld [vmem:[#allocation5 + $0x208] sm:$0xff] }
  0x24   :  { %220 = vmatpush1.xpose.msra.mxu0 %v147_v10  ;;  %290 = vmatpush1.xpose.msra.mxu1 %v149_v11  ;;  %v641_v33 = vrot.slane %v41_v32, %v638_v27  ;;  %v173_v34 = vcombine.high %v41_v32, %v41_v32  ;;  %v117_v36 = vld [vmem:[#allocation5 + $0x250] sm:$0xff]  ;;  %v110_v38 = vld [vmem:[#allocation5 + $0x218] sm:$0xff]  ;;  %v107_v42 = vld [vmem:[#allocation5 + $0x200] sm:$0xff] }
  0x25   :  { %221 = vmatprep.subr.mxu0 %v140_v12  ;;  %291 = vmatprep.subr.mxu1 %v142_v13  ;;  %v109_v43 = vld [vmem:[#allocation5 + $0x210] sm:$0xff]  ;;  %v100_v44 = vld [vmem:[#allocation5 + $0x1c8] sm:$0xff]  ;;  %v102_v45 = vld [vmem:[#allocation5 + $0x1d8] sm:$0xff] }
  0x26   :  { %v188_v39 = vcombine.high %v641_v33, %v641_v33  ;;  %v646_v40 = vrot.slane %v173_v34, %v638_v27  ;;  %v99_v46 = vld [vmem:[#allocation5 + $0x1c0] sm:$0xff]  ;;  %v101_v47 = vld [vmem:[#allocation5 + $0x1d0] sm:$0xff]  ;;  %v92_v48 = vld [vmem:[#allocation5 + $0x188] sm:$0xff] }
  0x27   :  { %v94_v49 = vld [vmem:[#allocation5 + $0x198] sm:$0xff]  ;;  %v91_v50 = vld [vmem:[#allocation5 + $0x180] sm:$0xff]  ;;  %v93_v51 = vld [vmem:[#allocation5 + $0x190] sm:$0xff] }
  0x28   :  { %222 = vmatpush1.xpose.msra.mxu0 %v139_v17  ;;  %292 = vmatpush1.xpose.msra.mxu1 %v141_v18  ;;  %v189_v41 = vcombine.high %v646_v40, %v646_v40  ;;  %v84_v52 = vld [vmem:[#allocation5 + $0x148] sm:$0xff]  ;;  %v86_v53 = vld [vmem:[#allocation5 + $0x158] sm:$0xff]  ;;  %v83_v54 = vld [vmem:[#allocation5 + $0x140] sm:$0xff] }
  0x29   :  { %223 = vmatprep.subr.mxu0 %v132_v19  ;;  %293 = vmatprep.subr.mxu1 %v134_v20  ;;  %v85_v55 = vld [vmem:[#allocation5 + $0x150] sm:$0xff]  ;;  %v76_v56 = vld [vmem:[#allocation5 + $0x108] sm:$0xff]  ;;  %v78_v57 = vld [vmem:[#allocation5 + $0x118] sm:$0xff] }
  0x2a   :  { %279 = vmatprep.mubr.f32.mxu0 %v188_v39  ;;  %349 = vmatprep.mubr.f32.mxu1 %v189_v41  ;;  %v75_v58 = vld [vmem:[#allocation5 + $0x100] sm:$0xff]  ;;  %v77_v59 = vld [vmem:[#allocation5 + $0x110] sm:$0xff]  ;;  %v68_v60 = vld [vmem:[#allocation5 + $0xc8] sm:$0xff] }
  0x2b   :  { %v70_v61 = vld [vmem:[#allocation5 + $0xd8] sm:$0xff]  ;;  %v67_v62 = vld [vmem:[#allocation5 + $0xc0] sm:$0xff]  ;;  %v69_v63 = vld [vmem:[#allocation5 + $0xd0] sm:$0xff] }
  0x2c   :  { %224 = vmatpush1.xpose.msra.mxu0 %v131_v23  ;;  %294 = vmatpush1.xpose.msra.mxu1 %v133_v24  ;;  %v60_v0 = vld [vmem:[#allocation5 + $0x88] sm:$0xff]  ;;  %v62_v1 = vld [vmem:[#allocation5 + $0x98] sm:$0xff]  ;;  %v59_v2 = vld [vmem:[#allocation5 + $0x80] sm:$0xff] }
  0x2d   :  { %225 = vmatprep.subr.mxu0 %v124_v25  ;;  %295 = vmatprep.subr.mxu1 %v126_v26  ;;  %v61_v3 = vld [vmem:[#allocation5 + $0x90] sm:$0xff]  ;;  %v52_v4 = vld [vmem:[#allocation5 + $0x48] sm:$0xff]  ;;  %v54_v5 = vld [vmem:[#allocation5 + $0x58] sm:$0xff] }
  0x2e   :  { %v42_v6 = vld [vmem:[#allocation2 + $0x8] sm:$0xff]  ;;  %v51_v7 = vld [vmem:[#allocation5 + $0x40] sm:$0xff]  ;;  %v53_v8 = vld [vmem:[#allocation5 + $0x50] sm:$0xff] }
  0x2f   :  { %v44_v9 = vld [vmem:[#allocation5 + $0x8] sm:$0xff]  ;;  %v46_v10 = vld [vmem:[#allocation5 + $0x18] sm:$0xff]  ;;  %v190_v11 = vcombine.high %v42_v6, %v42_v6  ;;  %v43_v12 = vld [vmem:[#allocation5] sm:$0xff]  ;;  %v651_v16 = vrot.slane %v42_v6, %v638_v27 }
  0x30   :  { %226 = vmatpush1.xpose.msra.mxu0 %v123_v28  ;;  %296 = vmatpush1.xpose.msra.mxu1 %v125_v29  ;;  %v45_v13 = vld [vmem:[#allocation5 + $0x10] sm:$0xff]  ;;  %v168_v14 = vld [vmem:[#allocation5 + $0x3e8] sm:$0xff]  ;;  %v170_v15 = vld [vmem:[#allocation5 + $0x3f8] sm:$0xff] }
  0x31   :  { %227 = vmatprep.subr.mxu0 %v116_v30  ;;  %297 = vmatprep.subr.mxu1 %v118_v31  ;;  %v654_v17 = vrot.slane %v190_v11, %v638_v27  ;;  %v167_v18 = vld [vmem:[#allocation5 + $0x3e0] sm:$0xff]  ;;  %v169_v19 = vld [vmem:[#allocation5 + $0x3f0] sm:$0xff]  ;;  %v160_v20 = vld [vmem:[#allocation5 + $0x3a8] sm:$0xff]  ;;  %v205_v22 = vcombine.high %v651_v16, %v651_v16 }
  0x32   :  { %v162_v21 = vld [vmem:[#allocation5 + $0x3b8] sm:$0xff]  ;;  %v159_v24 = vld [vmem:[#allocation5 + $0x3a0] sm:$0xff]  ;;  %v161_v25 = vld [vmem:[#allocation5 + $0x3b0] sm:$0xff] }
  0x33   :  { %v206_v23 = vcombine.high %v654_v17, %v654_v17  ;;  %v152_v26 = vld [vmem:[#allocation5 + $0x368] sm:$0xff]  ;;  %v154_v27 = vld [vmem:[#allocation5 + $0x378] sm:$0xff]  ;;  %v151_v28 = vld [vmem:[#allocation5 + $0x360] sm:$0xff] }
  0x34   :  { %228 = vmatpush1.xpose.msra.mxu0 %v115_v35  ;;  %298 = vmatpush1.xpose.msra.mxu1 %v117_v36  ;;  %v153_v29 = vld [vmem:[#allocation5 + $0x370] sm:$0xff]  ;;  %v144_v30 = vld [vmem:[#allocation5 + $0x328] sm:$0xff]  ;;  %v146_v31 = vld [vmem:[#allocation5 + $0x338] sm:$0xff] }
  0x35   :  { %229 = vmatprep.subr.mxu0 %v108_v37  ;;  %299 = vmatprep.subr.mxu1 %v110_v38  ;;  %v143_v32 = vld [vmem:[#allocation5 + $0x320] sm:$0xff]  ;;  %v136_v34 = vld [vmem:[#allocation5 + $0x2e8] sm:$0xff]  ;;  %v138_v35 = vld [vmem:[#allocation5 + $0x2f8] sm:$0xff] }
  0x36   :  { %v135_v36 = vld [vmem:[#allocation5 + $0x2e0] sm:$0xff]  ;;  %v137_v37 = vld [vmem:[#allocation5 + $0x2f0] sm:$0xff]  ;;  %v128_v38 = vld [vmem:[#allocation5 + $0x2a8] sm:$0xff] }
  0x37   :  { %v130_v39 = vld [vmem:[#allocation5 + $0x2b8] sm:$0xff]  ;;  %v129_v41 = vld [vmem:[#allocation5 + $0x2b0] sm:$0xff]  ;;  %v64_v6 = vld [vmem:[#allocation5 + $0xa8] sm:$0xff] }
  0x38   :  { %230 = vmatpush1.xpose.msra.mxu0 %v107_v42  ;;  %300 = vmatpush1.xpose.msra.mxu1 %v109_v43  ;;  %v120_v42 = vld [vmem:[#allocation5 + $0x268] sm:$0xff]  ;;  %v122_v43 = vld [vmem:[#allocation5 + $0x278] sm:$0xff] }
  0x39   :  { %231 = vmatprep.subr.mxu0 %v100_v44  ;;  %301 = vmatprep.subr.mxu1 %v102_v45  ;;  %v119_v44 = vld [vmem:[#allocation5 + $0x260] sm:$0xff]  ;;  %v121_v45 = vld [vmem:[#allocation5 + $0x270] sm:$0xff]  ;;  %v58_v11 = vld [vmem:[#allocation5 + $0x78] sm:$0xff] }
  0x3c   :  { %232 = vmatpush1.xpose.msra.mxu0 %v99_v46  ;;  %302 = vmatpush1.xpose.msra.mxu1 %v101_v47  ;;  %v112_v46 = vld [vmem:[#allocation5 + $0x228] sm:$0xff]  ;;  %v114_v47 = vld [vmem:[#allocation5 + $0x238] sm:$0xff] }
  0x3d   :  { %233 = vmatprep.subr.mxu0 %v92_v48  ;;  %303 = vmatprep.subr.mxu1 %v94_v49  ;;  %v111_v48 = vld [vmem:[#allocation5 + $0x220] sm:$0xff]  ;;  %v113_v49 = vld [vmem:[#allocation5 + $0x230] sm:$0xff] }
  0x40   :  { %234 = vmatpush1.xpose.msra.mxu0 %v91_v50  ;;  %304 = vmatpush1.xpose.msra.mxu1 %v93_v51  ;;  %v104_v50 = vld [vmem:[#allocation5 + $0x1e8] sm:$0xff]  ;;  %v106_v51 = vld [vmem:[#allocation5 + $0x1f8] sm:$0xff] }
  0x41   :  { %235 = vmatprep.subr.mxu0 %v84_v52  ;;  %305 = vmatprep.subr.mxu1 %v86_v53  ;;  %v103_v52 = vld [vmem:[#allocation5 + $0x1e0] sm:$0xff]  ;;  %v105_v53 = vld [vmem:[#allocation5 + $0x1f0] sm:$0xff] }
  0x44   :  { %236 = vmatpush1.xpose.msra.mxu0 %v83_v54  ;;  %306 = vmatpush1.xpose.msra.mxu1 %v85_v55  ;;  %v96_v54 = vld [vmem:[#allocation5 + $0x1a8] sm:$0xff]  ;;  %v98_v55 = vld [vmem:[#allocation5 + $0x1b8] sm:$0xff] }
  0x45   :  { %237 = vmatprep.subr.mxu0 %v76_v56  ;;  %307 = vmatprep.subr.mxu1 %v78_v57  ;;  %v95_v56 = vld [vmem:[#allocation5 + $0x1a0] sm:$0xff]  ;;  %v97_v57 = vld [vmem:[#allocation5 + $0x1b0] sm:$0xff] }
  0x48   :  { %238 = vmatpush1.xpose.msra.mxu0 %v75_v58  ;;  %308 = vmatpush1.xpose.msra.mxu1 %v77_v59  ;;  %v88_v58 = vld [vmem:[#allocation5 + $0x168] sm:$0xff]  ;;  %v90_v59 = vld [vmem:[#allocation5 + $0x178] sm:$0xff] }
  0x49   :  { %239 = vmatprep.subr.mxu0 %v68_v60  ;;  %309 = vmatprep.subr.mxu1 %v70_v61  ;;  %v87_v60 = vld [vmem:[#allocation5 + $0x160] sm:$0xff]  ;;  %v89_v61 = vld [vmem:[#allocation5 + $0x170] sm:$0xff] }
  0x4c   :  { %240 = vmatpush1.xpose.msra.mxu0 %v67_v62  ;;  %310 = vmatpush1.xpose.msra.mxu1 %v69_v63  ;;  %v80_v62 = vld [vmem:[#allocation5 + $0x128] sm:$0xff]  ;;  %v82_v63 = vld [vmem:[#allocation5 + $0x138] sm:$0xff] }
  0x4d   :  { %241 = vmatprep.subr.mxu0 %v60_v0  ;;  %311 = vmatprep.subr.mxu1 %v62_v1  ;;  %v79_v0 = vld [vmem:[#allocation5 + $0x120] sm:$0xff]  ;;  %v81_v1 = vld [vmem:[#allocation5 + $0x130] sm:$0xff] }
  0x50   :  { %242 = vmatpush1.xpose.msra.mxu0 %v59_v2  ;;  %312 = vmatpush1.xpose.msra.mxu1 %v61_v3  ;;  %v72_v2 = vld [vmem:[#allocation5 + $0xe8] sm:$0xff]  ;;  %v74_v3 = vld [vmem:[#allocation5 + $0xf8] sm:$0xff] }
  0x51   :  { %243 = vmatprep.subr.mxu0 %v52_v4  ;;  %313 = vmatprep.subr.mxu1 %v54_v5  ;;  %v71_v4 = vld [vmem:[#allocation5 + $0xe0] sm:$0xff]  ;;  %v73_v5 = vld [vmem:[#allocation5 + $0xf0] sm:$0xff] }
  0x54   :  { %244 = vmatpush1.xpose.msra.mxu0 %v51_v7  ;;  %314 = vmatpush1.xpose.msra.mxu1 %v53_v8  ;;  %v66_v7 = vld [vmem:[#allocation5 + $0xb8] sm:$0xff]  ;;  %v63_v8 = vld [vmem:[#allocation5 + $0xa0] sm:$0xff] }
  0x55   :  { %245 = vmatprep.subr.mxu0 %v44_v9  ;;  %315 = vmatprep.subr.mxu1 %v46_v10  ;;  %v65_v9 = vld [vmem:[#allocation5 + $0xb0] sm:$0xff]  ;;  %v56_v10 = vld [vmem:[#allocation5 + $0x68] sm:$0xff] }
  0x58   :  { %246 = vmatpush1.xpose.msra.mxu0 %v43_v12  ;;  %316 = vmatpush1.xpose.msra.mxu1 %v45_v13  ;;  %v55_v12 = vld [vmem:[#allocation5 + $0x60] sm:$0xff]  ;;  %v57_v13 = vld [vmem:[#allocation5 + $0x70] sm:$0xff] }
  0x59   :  { %355 = vmatprep.subr.mxu0 %v168_v14  ;;  %425 = vmatprep.subr.mxu1 %v170_v15  ;;  %v48_v14 = vld [vmem:[#allocation5 + $0x28] sm:$0xff]  ;;  %v50_v15 = vld [vmem:[#allocation5 + $0x38] sm:$0xff] }
  0x5b   :  { %280 = vmatmul.mubr.f32.vlgmr.msra.gmra.mxu0 %v641_v33  ;;  %350 = vmatmul.mubr.f32.vlgmr.msra.gmra.mxu1 %v646_v40  ;;  %v145_v33 = vld [vmem:[#allocation5 + $0x330] sm:$0xff]  ;;  %v127_v40 = vld [vmem:[#allocation5 + $0x2a0] sm:$0xff] }
  0x5c   :  { %356 = vmatpush1.xpose.msra.mxu0 %v167_v18  ;;  %426 = vmatpush1.xpose.msra.mxu1 %v169_v19  ;;  %v47_v18 = vld [vmem:[#allocation5 + $0x20] sm:$0xff]  ;;  %v49_v19 = vld [vmem:[#allocation5 + $0x30] sm:$0xff] }
  0x5d   :  { %357 = vmatprep.subr.mxu0 %v160_v20  ;;  %427 = vmatprep.subr.mxu1 %v162_v21 }
  0x5e   :  { %419 = vmatprep.mubr.f32.mxu0 %v205_v22  ;;  %489 = vmatprep.mubr.f32.mxu1 %v206_v23 }
  0x60   :  { %358 = vmatpush1.xpose.msra.mxu0 %v159_v24  ;;  %428 = vmatpush1.xpose.msra.mxu1 %v161_v25 }
  0x61   :  { %359 = vmatprep.subr.mxu0 %v152_v26  ;;  %429 = vmatprep.subr.mxu1 %v154_v27 }
  0x64   :  { %360 = vmatpush1.xpose.msra.mxu0 %v151_v28  ;;  %430 = vmatpush1.xpose.msra.mxu1 %v153_v29  ;;  %v531_v28 = vld [vmem:[%s672_s2] ss:$0 sm:$0xff] }
  0x65   :  { %361 = vmatprep.subr.mxu0 %v144_v30  ;;  %431 = vmatprep.subr.mxu1 %v146_v31 }
  0x68   :  { %362 = vmatpush1.xpose.msra.mxu0 %v143_v32  ;;  %432 = vmatpush1.xpose.msra.mxu1 %v145_v33 }
  0x69   :  { %363 = vmatprep.subr.mxu0 %v136_v34  ;;  %433 = vmatprep.subr.mxu1 %v138_v35 }
  0x6c   :  { %364 = vmatpush1.xpose.msra.mxu0 %v135_v36  ;;  %434 = vmatpush1.xpose.msra.mxu1 %v137_v37 }
  0x6d   :  { %365 = vmatprep.subr.mxu0 %v128_v38  ;;  %435 = vmatprep.subr.mxu1 %v130_v39 }
  0x70   :  { %366 = vmatpush1.xpose.msra.mxu0 %v127_v40  ;;  %436 = vmatpush1.xpose.msra.mxu1 %v129_v41 }
  0x71   :  { %367 = vmatprep.subr.mxu0 %v120_v42  ;;  %437 = vmatprep.subr.mxu1 %v122_v43 }
  0x74   :  { %368 = vmatpush1.xpose.msra.mxu0 %v119_v44  ;;  %438 = vmatpush1.xpose.msra.mxu1 %v121_v45 }
  0x75   :  { %369 = vmatprep.subr.mxu0 %v112_v46  ;;  %439 = vmatprep.subr.mxu1 %v114_v47 }
  0x78   :  { %370 = vmatpush1.xpose.msra.mxu0 %v111_v48  ;;  %440 = vmatpush1.xpose.msra.mxu1 %v113_v49 }
  0x79   :  { %371 = vmatprep.subr.mxu0 %v104_v50  ;;  %441 = vmatprep.subr.mxu1 %v106_v51 }
  0x7c   :  { %372 = vmatpush1.xpose.msra.mxu0 %v103_v52  ;;  %442 = vmatpush1.xpose.msra.mxu1 %v105_v53 }
  0x7d   :  { %373 = vmatprep.subr.mxu0 %v96_v54  ;;  %443 = vmatprep.subr.mxu1 %v98_v55 }
  0x80   :  { %374 = vmatpush1.xpose.msra.mxu0 %v95_v56  ;;  %444 = vmatpush1.xpose.msra.mxu1 %v97_v57 }
  0x81   :  { %375 = vmatprep.subr.mxu0 %v88_v58  ;;  %445 = vmatprep.subr.mxu1 %v90_v59 }
  0x84   :  { %376 = vmatpush1.xpose.msra.mxu0 %v87_v60  ;;  %446 = vmatpush1.xpose.msra.mxu1 %v89_v61 }
  0x85   :  { %377 = vmatprep.subr.mxu0 %v80_v62  ;;  %447 = vmatprep.subr.mxu1 %v82_v63 }
  0x88   :  { %378 = vmatpush1.xpose.msra.mxu0 %v79_v0  ;;  %448 = vmatpush1.xpose.msra.mxu1 %v81_v1 }
  0x89   :  { %379 = vmatprep.subr.mxu0 %v72_v2  ;;  %449 = vmatprep.subr.mxu1 %v74_v3 }
  0x8c   :  { %380 = vmatpush1.xpose.msra.mxu0 %v71_v4  ;;  %450 = vmatpush1.xpose.msra.mxu1 %v73_v5 }
  0x8d   :  { %381 = vmatprep.subr.mxu0 %v64_v6  ;;  %451 = vmatprep.subr.mxu1 %v66_v7 }
  0x90   :  { %382 = vmatpush1.xpose.msra.mxu0 %v63_v8  ;;  %452 = vmatpush1.xpose.msra.mxu1 %v65_v9 }
  0x91   :  { %383 = vmatprep.subr.mxu0 %v56_v10  ;;  %453 = vmatprep.subr.mxu1 %v58_v11 }
  0x94   :  { %384 = vmatpush1.xpose.msra.mxu0 %v55_v12  ;;  %454 = vmatpush1.xpose.msra.mxu1 %v57_v13 }
  0x95   :  { %385 = vmatprep.subr.mxu0 %v48_v14  ;;  %455 = vmatprep.subr.mxu1 %v50_v15 }
  0x98   :  { %386 = vmatpush1.xpose.msra.mxu0 %v47_v18  ;;  %456 = vmatpush1.xpose.msra.mxu1 %v49_v19 }
  0x9b   :  { %420 = vmatmul.mubr.f32.vlgmr.msra.gmra.mxu0 %v651_v16  ;;  %490 = vmatmul.mubr.f32.vlgmr.msra.gmra.mxu1 %v654_v17 }
 0x11b   :  { %v281_v20 = vpop.f32.mrf.mxu0  ;;  %v351_v21 = vpop.f32.mrf.mxu1 }
 0x11c   :  { %v352_v24 = vadd.f32 %v351_v21, %v281_v20 }
 0x11d   :  { %v283_v22 = vpop.f32.mrf.mxu0  ;;  %v353_v23 = vpop.f32.mrf.mxu1 }
 0x15b   :  { %v421_v25 = vpop.f32.mrf.mxu0  ;;  %v491_v26 = vpop.f32.mrf.mxu1 }
 0x15c   :  { %v422_v27 = vadd.f32 %v421_v25, %v352_v24 }
 0x15d   :  { %v423_v29 = vpop.f32.mrf.mxu0  ;;  %v493_v30 = vpop.f32.mrf.mxu1 }
 0x15e   :  { %v492_v31 = vadd.f32 %v491_v26, %v422_v27 }
 0x160   :  { %v506_v16 = vadd.f32 %v531_v28, %v492_v31 }
 0x162   :  { %507 = vst [vmem:[#allocation7] sm:$0x3] %v506_v16 }
 0x163   :  { %591 = shalt.err (!%p588_p0)
}
 0x164   :  { %524 = dma.vmem_to_hbm [thread:$0]  %s522_s25, 32, %s673_s3, [#allocation4]  }
 0x165   :  { %604 = dma.done.wait [#allocation4], 32  }
 0x166   :  { %605 = vsyncadd [#allocation4], 4294967264 }
 0x167   :  { %528 = vsyncpa [#allocation3], 1 }
 0x168   :  { %529 = vsyncpa [#allocation6], 1 }
 0x169   :  { %530 = vsyncpa [#allocation4], 1 }

</bundles_post_ra>
